<compile_context>
chip_gen: v7x
topology: tpu7x:2x2x1
jax: 0.10.0
libtpu: 0.0.40
codegen_flags: <defaults>
</compile_context>

<pallas_src>
import functools

import jax
import jax.numpy as jnp
from jax import lax
from jax.experimental import pallas as pl
from jax.experimental.pallas import tpu as pltpu


# ----------------------------------------------------------------------------
# Pallas kernel: fused row-gather + per-row p-norm of (h + r - t)
# ----------------------------------------------------------------------------
def _transe_kernel(h_idx_ref, r_idx_ref, t_idx_ref,     # scalar prefetch (SMEM)
                   ent_hbm, rel_hbm,                    # embedding tables (HBM)
                   out_ref,                             # (1, 1, TB) VMEM output
                   h_buf, r_buf, t_buf, sem,            # VMEM scratch + DMA sems
                   *, p, tb):
    i = pl.program_id(0)
    base = i * tb

    # Issue all 3*TB row DMAs (HBM gather -> VMEM scratch), then wait for all.
    def _issue(j, carry):
        h_row = h_idx_ref[base + j]
        r_row = r_idx_ref[base + j]
        t_row = t_idx_ref[base + j]
        pltpu.make_async_copy(ent_hbm.at[h_row], h_buf.at[j], sem.at[0]).start()
        pltpu.make_async_copy(rel_hbm.at[r_row], r_buf.at[j], sem.at[1]).start()
        pltpu.make_async_copy(ent_hbm.at[t_row], t_buf.at[j], sem.at[2]).start()
        return carry

    lax.fori_loop(0, tb, _issue, 0)

    def _wait(j, carry):
        # Wait handles only need the right copy size (one (D,) row each).
        pltpu.make_async_copy(ent_hbm.at[0], h_buf.at[0], sem.at[0]).wait()
        pltpu.make_async_copy(rel_hbm.at[0], r_buf.at[0], sem.at[1]).wait()
        pltpu.make_async_copy(ent_hbm.at[0], t_buf.at[0], sem.at[2]).wait()
        return carry

    lax.fori_loop(0, tb, _wait, 0)

    d = h_buf[...] + r_buf[...] - t_buf[...]          # (TB, D) f32 on the VPU
    if p == 1:
        dist = jnp.sum(jnp.abs(d), axis=1)            # (TB,)
    elif p == 2:
        dist = jnp.sqrt(jnp.sum(d * d, axis=1))       # (TB,)
    else:  # general p (matches torch.norm(p=...))
        dist = jnp.power(jnp.sum(jnp.power(jnp.abs(d), float(p)), axis=1),
                         1.0 / float(p))
    out_ref[0, 0, :] = dist                           # lane-dense store


def transe_distance(ent_emb, rel_emb, h, r, t, *, p=2, tb=1024):
    """Fused gather + distance: returns (B,) float32 = ||ent[h] + rel[r] - ent[t]||_p."""
    B = int(h.shape[0])
    D = int(ent_emb.shape[1])
    TB = int(min(tb, B))
    num_tiles = (B + TB - 1) // TB
    B_pad = num_tiles * TB

    h = h.astype(jnp.int32)
    r = r.astype(jnp.int32)
    t = t.astype(jnp.int32)
    if B_pad != B:                                    # pad tail tile with index 0
        pad = B_pad - B
        h = jnp.pad(h, (0, pad))
        r = jnp.pad(r, (0, pad))
        t = jnp.pad(t, (0, pad))

    kernel = functools.partial(_transe_kernel, p=p, tb=TB)
    out = pl.pallas_call(
        kernel,
        out_shape=jax.ShapeDtypeStruct((num_tiles, 1, TB), jnp.float32),
        grid_spec=pltpu.PrefetchScalarGridSpec(
            num_scalar_prefetch=3,                    # h, r, t index arrays -> SMEM
            grid=(num_tiles,),
            in_specs=[
                pl.BlockSpec(memory_space=pl.ANY),    # ent_emb stays in HBM
                pl.BlockSpec(memory_space=pl.ANY),    # rel_emb stays in HBM
            ],
            out_specs=pl.BlockSpec((1, 1, TB), lambda i, hi, ri, ti: (i, 0, 0)),
            scratch_shapes=[
                pltpu.VMEM((TB, D), jnp.float32),     # gathered h rows
                pltpu.VMEM((TB, D), jnp.float32),     # gathered r rows
                pltpu.VMEM((TB, D), jnp.float32),     # gathered t rows
                pltpu.SemaphoreType.DMA((3,)),
            ],
        ),
        compiler_params=pltpu.CompilerParams(
            dimension_semantics=("parallel",),        # megacore split on v7x
        ),
    )(h, r, t, ent_emb, rel_emb)
    return out.reshape(B_pad)[:B]


# ----------------------------------------------------------------------------
# Parameter init (matches torch: xavier_uniform_ then F.normalize(p=2, dim=1))
# ----------------------------------------------------------------------------
def _xavier_uniform(key, num, dim):
    bound = jnp.sqrt(6.0 / (num + dim))
    w = jax.random.uniform(key, (num, dim), jnp.float32, -bound, bound)
    norm = jnp.sqrt(jnp.sum(w * w, axis=1, keepdims=True))
    return w / jnp.maximum(norm, 1e-12)


class TransE:
    def __init__(self, ent_num, rel_num, dim=100, margin=1.0, norm=2, key=None,
                 batch_tile=1024):
        self.ent_num, self.rel_num, self.dim = ent_num, rel_num, dim
        self.norm, self.margin = norm, margin
        self.batch_tile = batch_tile
        if key is None:
            key = jax.random.PRNGKey(0)
        k_ent, k_rel = jax.random.split(key)
        self.ent_emb = _xavier_uniform(k_ent, ent_num, dim)
        self.rel_emb = _xavier_uniform(k_rel, rel_num, dim)

    def forward(self, h, r, t):
        # gather + distance fused in one Pallas kernel (no wrapper-side jnp.take)
        return transe_distance(self.ent_emb, self.rel_emb, h, r, t,
                               p=self.norm, tb=self.batch_tile)

    # TODO(synk): loss() (MarginRankingLoss) and evaluate() (cdist ranking) are
    # training/eval utilities, not part of forward(); not ported to Pallas.


if __name__ == "__main__":
    ent_num, rel_num, dim = 64, 16, 128

    key = jax.random.PRNGKey(0)
    k_model, k_h, k_r, k_t, k_h2, k_r2, k_t2 = jax.random.split(key, 7)

    model = TransE(ent_num, rel_num, dim=dim, norm=2, key=k_model)

    def reference(h, r, t):
        h_e = jnp.take(model.ent_emb, h, axis=0)
        r_e = jnp.take(model.rel_emb, r, axis=0)
        t_e = jnp.take(model.ent_emb, t, axis=0)
        return jnp.linalg.norm(h_e + r_e - t_e, ord=2, axis=1)

    # Case 1: small batch, single tile.
    batch = 8
    h = jax.random.randint(k_h, (batch,), 0, ent_num, dtype=jnp.int32)
    r = jax.random.randint(k_r, (batch,), 0, rel_num, dtype=jnp.int32)
    t = jax.random.randint(k_t, (batch,), 0, ent_num, dtype=jnp.int32)
    dist = jax.block_until_ready(model.forward(h, r, t))
    assert dist.shape == (batch,)
    assert jnp.allclose(dist, reference(h, r, t), atol=1e-5, rtol=1e-5)

    # Case 2: multiple tiles + tail padding (small tile to exercise the tiled path).
    batch2 = 20
    h2 = jax.random.randint(k_h2, (batch2,), 0, ent_num, dtype=jnp.int32)
    r2 = jax.random.randint(k_r2, (batch2,), 0, rel_num, dtype=jnp.int32)
    t2 = jax.random.randint(k_t2, (batch2,), 0, ent_num, dtype=jnp.int32)
    dist2 = jax.block_until_ready(
        transe_distance(model.ent_emb, model.rel_emb, h2, r2, t2, p=2, tb=8))
    assert dist2.shape == (batch2,)
    assert jnp.allclose(dist2, reference(h2, r2, t2), atol=1e-5, rtol=1e-5)

    print("KERNEL_OK")
</pallas_src>

<mosaic_0001>
module attributes {stable_mosaic.version = 11 : i64} {
  func.func @_transe_kernel(%arg0: i32, %arg1: memref<8xi32, #tpu.memory_space<smem>>, %arg2: memref<8xi32, #tpu.memory_space<smem>>, %arg3: memref<8xi32, #tpu.memory_space<smem>>, %arg4: memref<64x128xf32, #tpu.memory_space<any>>, %arg5: memref<16x128xf32, #tpu.memory_space<any>>, %arg6: memref<1x1x8xf32, #tpu.memory_space<vmem>>, %arg7: memref<8x128xf32, #tpu.memory_space<vmem>>, %arg8: memref<8x128xf32, #tpu.memory_space<vmem>>, %arg9: memref<8x128xf32, #tpu.memory_space<vmem>>, %arg10: memref<3x!tpu.dma_semaphore, #tpu.memory_space<semaphore_mem>>) attributes {dimension_semantics = [#tpu.dimension_semantics<parallel>], iteration_bounds = array<i64: 1>, scalar_prefetch = 3 : i64, scratch_operands = 4 : i64, tpu.core_type = #tpu.core_type<tc>, window_params = [{}, {}, {transform_indices = @transform_2, window_bounds = array<i64: 1, 1, 8>}]} {
    %c8_i32 = arith.constant 8 : i32
    %0 = arith.muli %arg0, %c8_i32 : i32
    %c0_i32 = arith.constant 0 : i32
    %c8_i32_0 = arith.constant 8 : i32
    %1 = arith.addi %c0_i32, %c8_i32_0 : i32
    %c1_i32 = arith.constant 1 : i32
    scf.for %arg11 = %c0_i32 to %1 step %c1_i32  : i32 {
      %14 = arith.addi %0, %arg11 : i32
      %15 = arith.index_cast %14 : i32 to index
      %16 = memref.load %arg1[%15] : memref<8xi32, #tpu.memory_space<smem>>
      %17 = arith.addi %0, %arg11 : i32
      %18 = arith.index_cast %17 : i32 to index
      %19 = memref.load %arg2[%18] : memref<8xi32, #tpu.memory_space<smem>>
      %20 = arith.addi %0, %arg11 : i32
      %21 = arith.index_cast %20 : i32 to index
      %22 = memref.load %arg3[%21] : memref<8xi32, #tpu.memory_space<smem>>
      %c0_i32_13 = arith.constant 0 : i32
      %c0_i32_14 = arith.constant 0 : i32
      %23 = tpu.memref_slice %arg4[%16, %c0_i32_14] : memref<64x128xf32, #tpu.memory_space<any>> -> memref<1x128xf32, #tpu.memory_space<any>>
      %24 = tpu.memref_squeeze %23 : memref<1x128xf32, #tpu.memory_space<any>> -> memref<128xf32, #tpu.memory_space<any>>
      %c0_i32_15 = arith.constant 0 : i32
      %25 = tpu.memref_slice %arg7[%arg11, %c0_i32_15] : memref<8x128xf32, #tpu.memory_space<vmem>> -> memref<1x128xf32, #tpu.memory_space<vmem>>
      %26 = tpu.memref_squeeze %25 : memref<1x128xf32, #tpu.memory_space<vmem>> -> memref<128xf32, #tpu.memory_space<vmem>>
      %27 = tpu.memref_slice %arg10[%c0_i32_13] : memref<3x!tpu.dma_semaphore, #tpu.memory_space<semaphore_mem>> -> memref<1x!tpu.dma_semaphore, #tpu.memory_space<semaphore_mem>>
      %28 = tpu.memref_squeeze %27 : memref<1x!tpu.dma_semaphore, #tpu.memory_space<semaphore_mem>> -> memref<!tpu.dma_semaphore, #tpu.memory_space<semaphore_mem>>
      tpu.enqueue_dma source(%24 : memref<128xf32, #tpu.memory_space<any>>) target(%26 : memref<128xf32, #tpu.memory_space<vmem>>) target_semaphore(%28 : memref<!tpu.dma_semaphore, #tpu.memory_space<semaphore_mem>>)
      %c1_i32_16 = arith.constant 1 : i32
      %c0_i32_17 = arith.constant 0 : i32
      %29 = tpu.memref_slice %arg5[%19, %c0_i32_17] : memref<16x128xf32, #tpu.memory_space<any>> -> memref<1x128xf32, #tpu.memory_space<any>>
      %30 = tpu.memref_squeeze %29 : memref<1x128xf32, #tpu.memory_space<any>> -> memref<128xf32, #tpu.memory_space<any>>
      %c0_i32_18 = arith.constant 0 : i32
      %31 = tpu.memref_slice %arg8[%arg11, %c0_i32_18] : memref<8x128xf32, #tpu.memory_space<vmem>> -> memref<1x128xf32, #tpu.memory_space<vmem>>
      %32 = tpu.memref_squeeze %31 : memref<1x128xf32, #tpu.memory_space<vmem>> -> memref<128xf32, #tpu.memory_space<vmem>>
      %33 = tpu.memref_slice %arg10[%c1_i32_16] : memref<3x!tpu.dma_semaphore, #tpu.memory_space<semaphore_mem>> -> memref<1x!tpu.dma_semaphore, #tpu.memory_space<semaphore_mem>>
      %34 = tpu.memref_squeeze %33 : memref<1x!tpu.dma_semaphore, #tpu.memory_space<semaphore_mem>> -> memref<!tpu.dma_semaphore, #tpu.memory_space<semaphore_mem>>
      tpu.enqueue_dma source(%30 : memref<128xf32, #tpu.memory_space<any>>) target(%32 : memref<128xf32, #tpu.memory_space<vmem>>) target_semaphore(%34 : memref<!tpu.dma_semaphore, #tpu.memory_space<semaphore_mem>>)
      %c2_i32 = arith.constant 2 : i32
      %c0_i32_19 = arith.constant 0 : i32
      %35 = tpu.memref_slice %arg4[%22, %c0_i32_19] : memref<64x128xf32, #tpu.memory_space<any>> -> memref<1x128xf32, #tpu.memory_space<any>>
      %36 = tpu.memref_squeeze %35 : memref<1x128xf32, #tpu.memory_space<any>> -> memref<128xf32, #tpu.memory_space<any>>
      %c0_i32_20 = arith.constant 0 : i32
      %37 = tpu.memref_slice %arg9[%arg11, %c0_i32_20] : memref<8x128xf32, #tpu.memory_space<vmem>> -> memref<1x128xf32, #tpu.memory_space<vmem>>
      %38 = tpu.memref_squeeze %37 : memref<1x128xf32, #tpu.memory_space<vmem>> -> memref<128xf32, #tpu.memory_space<vmem>>
      %39 = tpu.memref_slice %arg10[%c2_i32] : memref<3x!tpu.dma_semaphore, #tpu.memory_space<semaphore_mem>> -> memref<1x!tpu.dma_semaphore, #tpu.memory_space<semaphore_mem>>
      %40 = tpu.memref_squeeze %39 : memref<1x!tpu.dma_semaphore, #tpu.memory_space<semaphore_mem>> -> memref<!tpu.dma_semaphore, #tpu.memory_space<semaphore_mem>>
      tpu.enqueue_dma source(%36 : memref<128xf32, #tpu.memory_space<any>>) target(%38 : memref<128xf32, #tpu.memory_space<vmem>>) target_semaphore(%40 : memref<!tpu.dma_semaphore, #tpu.memory_space<semaphore_mem>>)
    }
    %c8_i32_1 = arith.constant 8 : i32
    %c0_i32_2 = arith.constant 0 : i32
    %c8_i32_3 = arith.constant 8 : i32
    %2 = arith.addi %c0_i32_2, %c8_i32_3 : i32
    %c1_i32_4 = arith.constant 1 : i32
    scf.for %arg11 = %c0_i32_2 to %2 step %c1_i32_4  : i32 {
      %c0_i32_13 = arith.constant 0 : i32
      %c0_i32_14 = arith.constant 0 : i32
      %c0_i32_15 = arith.constant 0 : i32
      %c0_i32_16 = arith.constant 0 : i32
      %14 = tpu.memref_slice %arg4[%c0_i32_13, %c0_i32_16] : memref<64x128xf32, #tpu.memory_space<any>> -> memref<1x128xf32, #tpu.memory_space<any>>
      %15 = tpu.memref_squeeze %14 : memref<1x128xf32, #tpu.memory_space<any>> -> memref<128xf32, #tpu.memory_space<any>>
      %c0_i32_17 = arith.constant 0 : i32
      %16 = tpu.memref_slice %arg7[%c0_i32_14, %c0_i32_17] : memref<8x128xf32, #tpu.memory_space<vmem>> -> memref<1x128xf32, #tpu.memory_space<vmem>>
      %17 = tpu.memref_squeeze %16 : memref<1x128xf32, #tpu.memory_space<vmem>> -> memref<128xf32, #tpu.memory_space<vmem>>
      %18 = tpu.memref_slice %arg10[%c0_i32_15] : memref<3x!tpu.dma_semaphore, #tpu.memory_space<semaphore_mem>> -> memref<1x!tpu.dma_semaphore, #tpu.memory_space<semaphore_mem>>
      %19 = tpu.memref_squeeze %18 : memref<1x!tpu.dma_semaphore, #tpu.memory_space<semaphore_mem>> -> memref<!tpu.dma_semaphore, #tpu.memory_space<semaphore_mem>>
      tpu.wait_dma2 semaphore(%19 : memref<!tpu.dma_semaphore, #tpu.memory_space<semaphore_mem>>) src(%15 : memref<128xf32, #tpu.memory_space<any>>) dst(%17 : memref<128xf32, #tpu.memory_space<vmem>>)
      %c0_i32_18 = arith.constant 0 : i32
      %c0_i32_19 = arith.constant 0 : i32
      %c1_i32_20 = arith.constant 1 : i32
      %c0_i32_21 = arith.constant 0 : i32
      %20 = tpu.memref_slice %arg5[%c0_i32_18, %c0_i32_21] : memref<16x128xf32, #tpu.memory_space<any>> -> memref<1x128xf32, #tpu.memory_space<any>>
      %21 = tpu.memref_squeeze %20 : memref<1x128xf32, #tpu.memory_space<any>> -> memref<128xf32, #tpu.memory_space<any>>
      %c0_i32_22 = arith.constant 0 : i32
      %22 = tpu.memref_slice %arg8[%c0_i32_19, %c0_i32_22] : memref<8x128xf32, #tpu.memory_space<vmem>> -> memref<1x128xf32, #tpu.memory_space<vmem>>
      %23 = tpu.memref_squeeze %22 : memref<1x128xf32, #tpu.memory_space<vmem>> -> memref<128xf32, #tpu.memory_space<vmem>>
      %24 = tpu.memref_slice %arg10[%c1_i32_20] : memref<3x!tpu.dma_semaphore, #tpu.memory_space<semaphore_mem>> -> memref<1x!tpu.dma_semaphore, #tpu.memory_space<semaphore_mem>>
      %25 = tpu.memref_squeeze %24 : memref<1x!tpu.dma_semaphore, #tpu.memory_space<semaphore_mem>> -> memref<!tpu.dma_semaphore, #tpu.memory_space<semaphore_mem>>
      tpu.wait_dma2 semaphore(%25 : memref<!tpu.dma_semaphore, #tpu.memory_space<semaphore_mem>>) src(%21 : memref<128xf32, #tpu.memory_space<any>>) dst(%23 : memref<128xf32, #tpu.memory_space<vmem>>)
      %c0_i32_23 = arith.constant 0 : i32
      %c0_i32_24 = arith.constant 0 : i32
      %c2_i32 = arith.constant 2 : i32
      %c0_i32_25 = arith.constant 0 : i32
      %26 = tpu.memref_slice %arg4[%c0_i32_23, %c0_i32_25] : memref<64x128xf32, #tpu.memory_space<any>> -> memref<1x128xf32, #tpu.memory_space<any>>
      %27 = tpu.memref_squeeze %26 : memref<1x128xf32, #tpu.memory_space<any>> -> memref<128xf32, #tpu.memory_space<any>>
      %c0_i32_26 = arith.constant 0 : i32
      %28 = tpu.memref_slice %arg9[%c0_i32_24, %c0_i32_26] : memref<8x128xf32, #tpu.memory_space<vmem>> -> memref<1x128xf32, #tpu.memory_space<vmem>>
      %29 = tpu.memref_squeeze %28 : memref<1x128xf32, #tpu.memory_space<vmem>> -> memref<128xf32, #tpu.memory_space<vmem>>
      %30 = tpu.memref_slice %arg10[%c2_i32] : memref<3x!tpu.dma_semaphore, #tpu.memory_space<semaphore_mem>> -> memref<1x!tpu.dma_semaphore, #tpu.memory_space<semaphore_mem>>
      %31 = tpu.memref_squeeze %30 : memref<1x!tpu.dma_semaphore, #tpu.memory_space<semaphore_mem>> -> memref<!tpu.dma_semaphore, #tpu.memory_space<semaphore_mem>>
      tpu.wait_dma2 semaphore(%31 : memref<!tpu.dma_semaphore, #tpu.memory_space<semaphore_mem>>) src(%27 : memref<128xf32, #tpu.memory_space<any>>) dst(%29 : memref<128xf32, #tpu.memory_space<vmem>>)
    }
    %c0 = arith.constant 0 : index
    %c0_5 = arith.constant 0 : index
    %3 = vector.load %arg7[%c0, %c0_5] : memref<8x128xf32, #tpu.memory_space<vmem>>, vector<8x128xf32>
    %c0_6 = arith.constant 0 : index
    %c0_7 = arith.constant 0 : index
    %4 = vector.load %arg8[%c0_6, %c0_7] : memref<8x128xf32, #tpu.memory_space<vmem>>, vector<8x128xf32>
    %5 = arith.addf %3, %4 : vector<8x128xf32>
    %c0_8 = arith.constant 0 : index
    %c0_9 = arith.constant 0 : index
    %6 = vector.load %arg9[%c0_8, %c0_9] : memref<8x128xf32, #tpu.memory_space<vmem>>, vector<8x128xf32>
    %7 = arith.subf %5, %6 : vector<8x128xf32>
    %8 = arith.mulf %7, %7 : vector<8x128xf32>
    %cst = arith.constant dense<0.000000e+00> : vector<8xf32>
    %9 = vector.multi_reduction <add>, %8, %cst [1] : vector<8x128xf32> to vector<8xf32>
    %10 = math.sqrt %9 : vector<8xf32>
    %c0_10 = arith.constant 0 : index
    %c0_11 = arith.constant 0 : index
    %c0_12 = arith.constant 0 : index
    %11 = vector.load %arg6[%c0_10, %c0_11, %c0_12] : memref<1x1x8xf32, #tpu.memory_space<vmem>>, vector<1x1x8xf32>
    %12 = vector.shape_cast %11 : vector<1x1x8xf32> to vector<8xf32>
    %13 = vector.shape_cast %10 : vector<8xf32> to vector<1x1x8xf32>
    tpu.vector_store %arg6[%c0_10, %c0_11, %c0_12], %13 {strides = array<i32>} : memref<1x1x8xf32, #tpu.memory_space<vmem>>, vector<1x1x8xf32>,
    return
  }
  func.func @transform_2(%arg0: i32, %arg1: memref<8xi32, #tpu.memory_space<smem>>, %arg2: memref<8xi32, #tpu.memory_space<smem>>, %arg3: memref<8xi32, #tpu.memory_space<smem>>) -> (i32, i32, i32) {
    %c0_i32 = arith.constant 0 : i32
    %c0_i32_0 = arith.constant 0 : i32
    %c0_i32_1 = arith.constant 0 : i32
    return %arg0, %c0_i32, %c0_i32_0 : i32, i32, i32
  }
}

</mosaic_0001>

<bundles_post_ra>
// kernel: tpu_custom_call.1
= control target key start
LH: loop header
LB: loop body
LE: loop exit
PB: predicated region body
PF: predicated region fallthrough
CT: control target
= control target key end

     0   :  { %s489_s0 = inlined_call_operand.hbm [shape: s32[8], index: 0, kind: input, shape index: {}]   ;;  %s490_s3 = inlined_call_operand.hbm [shape: f32[64,128], index: 3, kind: input, shape index: {}]   ;;  %s491_s4 = inlined_call_operand.hbm [shape: f32[16,128], index: 4, kind: input, shape index: {}]   ;;  %s492_s5 = inlined_call_operand.hbm [shape: f32[1,1,8], index: 5, kind: output, shape index: {}]   ;;  %s493_s1 = inlined_call_operand.vmem [shape: s32[8], index: 1, kind: input, shape index: {}]   ;;  %s494_s2 = inlined_call_operand.vmem [shape: s32[8], index: 2, kind: input, shape index: {}]  }
   0x1   :  { %s198_s20 = scalar_lea.hbm %s489_s0, 16 }
   0x2   :  { %p199_p0 = scmp.ne.s32.totalorder %s489_s0, %s198_s20  ;;  %p202_p1 = scmp.lt.u32.totalorder %s198_s20, %s489_s0 }
   0x4   :  { %p204_p2 = pnand %p202_p1, %p199_p0 }
   0x6   :  { %207 = shalt.err (!%p204_p2)  }
   0x7   :  { %s352_s25 = smov [#allocation7]   ;;  %s12_s30 = sshll.u32 %s493_s1, 4  ;;  %s13_s30 = int_to_ptr.vmem [resolvable:$true] %s12_s30 }
   0x8   :  { %11 = dma.hbm_to_smem %s489_s0, 16, %s352_s25, [#allocation6] }
   0x9   :  { %s16_s8 = sshll.u32 %s494_s2, 4  ;;  %s208_s9 = scalar_lea.vmem %s13_s30, 16  ;;  %s17_s8 = int_to_ptr.vmem [resolvable:$true] %s16_s8 }
   0xa   :  { %p209_p3 = scmp.ne.s32.totalorder %s13_s30, %s208_s9  ;;  %p213_p4 = scmp.lt.s32.totalorder %s13_s30, %s13_s30 }
   0xb   :  { %p214_p5 = scmp.lt.s32.totalorder %s208_s9, %s208_s9 }
   0xd   :  { %p215_p6 = por %p214_p5, %p213_p4 }
   0xf   :  { %p216_p7 = pnand %p215_p6, %p209_p3 }
  0x11   :  { %219 = shalt.err (!%p216_p7)  }
  0x12   :  { %s353_s10 = smov [#allocation8]   ;;  %s220_s0 = scalar_lea.vmem %s17_s8, 16 }
  0x13   :  { %15 = dma.vmem_to_smem %s13_s30, 16, %s353_s10, [#allocation6] }
  0x14   :  { %p221_p8 = scmp.ne.s32.totalorder %s17_s8, %s220_s0  ;;  %p225_p9 = scmp.lt.s32.totalorder %s17_s8, %s17_s8 }
  0x15   :  { %p226_p10 = scmp.lt.s32.totalorder %s220_s0, %s220_s0 }
  0x17   :  { %p227_p11 = por %p226_p10, %p225_p9 }
  0x19   :  { %p228_p12 = pnand %p227_p11, %p221_p8 }
  0x1b   :  { %231 = shalt.err (!%p228_p12)  }
  0x1c   :  { %s354_s1 = smov [#allocation9]  }
  0x1d   :  { %19 = dma.vmem_to_smem %s17_s8, 16, %s354_s1, [#allocation6] }
  0x1e   :  { %334 = dma.done.wait [#allocation6], 48 }
  0x1f   :  { %335 = vsyncadd [#allocation6], 4294967248 }
  0x20   :  { %21 = sfence }
  0x21   :  { %22 = vsyncpa [#allocation11], 0  ;;  %s407_s2 = smov 0  }
  0x22 LB: > { %s31_s11 = sld [smem:[#allocation7 + %s346_s2]]  ;;  %s36_s12 = scalar_lea.vmem [#allocation2], %s346_s2  ;;  %s346_s2 = sphi %s407_s2, %s29_s2  }
  0x23   : > { %s44_s13 = sshll.u32 %s36_s12, 4  ;;  %s415_s14 = sld [smem:[#allocation8 + %s346_s2]]  ;;  %s421_s13 = int_to_ptr.vmem [resolvable:$true] %s44_s13 }
  0x24   : > { %s50_s15 = scalar_lea.vmem [#allocation3], %s346_s2  ;;  %s419_s17 = sld [smem:[#allocation9 + %s346_s2]] }
  0x25   : > { %s59_s16 = sshll.u32 %s50_s15, 4  ;;  %s65_s18 = scalar_lea.vmem [#allocation4], %s346_s2  ;;  %s423_s16 = int_to_ptr.vmem [resolvable:$true] %s59_s16 }
  0x26   : > { %s74_s19 = sshll.u32 %s65_s18, 4  ;;  %s234_s28 = scalar_lea.hbm %s490_s3, 1024  ;;  %s426_s19 = int_to_ptr.vmem [resolvable:$true] %s74_s19 }
  0x28   : > { %s170_s20 = sshll.u32 %s31_s11, 4 }
  0x29   : > { %s35_s23 = scalar_lea.hbm %s490_s3, %s170_s20  ;;  %s171_s24 = sshll.u32 %s415_s14, 4 }
  0x2a   : > { %s232_s25 = scalar_lea.hbm %s35_s23, 16  ;;  %p235_p0 = scmp.lt.u32.totalorder %s35_s23, %s490_s3 }
  0x2b   : > { %p233_p13 = scmp.ne.s32.totalorder %s35_s23, %s232_s25  ;;  %p236_p1 = scmp.lt.u32.totalorder %s234_s28, %s232_s25 }
  0x2c   : > { %p238_p3 = scmp.lt.u32.totalorder %s232_s25, %s35_s23 }
  0x2d   : > { %p237_p2 = por %p236_p1, %p235_p0 }
  0x2f   : > { %p239_p4 = por %p238_p3, %p237_p2 }
  0x31   : > { %p240_p5 = pnand %p239_p4, %p233_p13 }
  0x33   : > { %243 = shalt.err (!%p240_p5)  }
  0x34   : > { %s244_s8 = scalar_lea.vmem %s421_s13, 16  ;;  %s355_s9 = smov [#allocation2]  }
  0x35   : > { %p245_p6 = scmp.ne.s32.totalorder %s421_s13, %s244_s8  ;;  %s246_s10 = sshll.u32 %s355_s9, 4  ;;  %s247_s10 = int_to_ptr.vmem [resolvable:$false] %s246_s10 }
  0x36   : > { %s248_s0 = scalar_lea.vmem %s247_s10, 128  ;;  %p249_p7 = scmp.lt.s32.totalorder %s421_s13, %s247_s10 }
  0x37   : > { %p250_p8 = scmp.lt.s32.totalorder %s248_s0, %s244_s8 }
  0x39   : > { %p251_p9 = por %p250_p8, %p249_p7 }
  0x3b   : > { %p252_p10 = pnand %p251_p9, %p245_p6 }
  0x3d   : > { %255 = shalt.err (!%p252_p10)  }
  0x3e   : > { %47 = dma.hbm_to_vmem [thread:$0]  %s35_s23, 16, %s421_s13, [#allocation5] }
  0x3f   : > { %s49_s12 = scalar_lea.hbm %s491_s4, %s171_s24  ;;  %s172_s14 = sshll.u32 %s419_s17, 4 }
  0x40   : > { %s256_s15 = scalar_lea.hbm %s49_s12, 16  ;;  %s258_s21 = scalar_lea.hbm %s491_s4, 256 }
  0x41   : > { %p257_p11 = scmp.ne.s32.totalorder %s49_s12, %s256_s15  ;;  %p259_p12 = scmp.lt.u32.totalorder %s49_s12, %s491_s4 }
  0x42   : > { %p260_p13 = scmp.lt.u32.totalorder %s258_s21, %s256_s15  ;;  %p262_p1 = scmp.lt.u32.totalorder %s256_s15, %s49_s12 }
  0x44   : > { %p261_p0 = por %p260_p13, %p259_p12 }
  0x46   : > { %p263_p2 = por %p262_p1, %p261_p0 }
  0x48   : > { %p264_p3 = pnand %p263_p2, %p257_p11 }
  0x4a   : > { %267 = shalt.err (!%p264_p3)  }
  0x4b   : > { %s268_s13 = scalar_lea.vmem %s423_s16, 16  ;;  %s356_s17 = smov [#allocation3]  }
  0x4c   : > { %p269_p4 = scmp.ne.s32.totalorder %s423_s16, %s268_s13  ;;  %s270_s23 = sshll.u32 %s356_s17, 4  ;;  %s271_s23 = int_to_ptr.vmem [resolvable:$false] %s270_s23 }
  0x4d   : > { %s272_s24 = scalar_lea.vmem %s271_s23, 128  ;;  %p273_p5 = scmp.lt.s32.totalorder %s423_s16, %s271_s23 }
  0x4e   : > { %p274_p6 = scmp.lt.s32.totalorder %s272_s24, %s268_s13 }
  0x50   : > { %p275_p7 = por %p274_p6, %p273_p5 }
  0x52   : > { %p276_p8 = pnand %p275_p7, %p269_p4 }
  0x54   : > { %279 = shalt.err (!%p276_p8)  }
  0x55   : > { %62 = dma.hbm_to_vmem [thread:$0]  %s49_s12, 16, %s423_s16, [#allocation5 + $0x1] }
  0x56   : > { %s64_s29 = scalar_lea.hbm %s490_s3, %s172_s14 }
  0x57   : > { %s280_s30 = scalar_lea.hbm %s64_s29, 16  ;;  %p283_p10 = scmp.lt.u32.totalorder %s64_s29, %s490_s3 }
  0x58   : > { %p281_p9 = scmp.ne.s32.totalorder %s64_s29, %s280_s30  ;;  %p284_p11 = scmp.lt.u32.totalorder %s234_s28, %s280_s30 }
  0x59   : > { %p286_p13 = scmp.lt.u32.totalorder %s280_s30, %s64_s29 }
  0x5a   : > { %p285_p12 = por %p284_p11, %p283_p10 }
  0x5c   : > { %p287_p0 = por %p286_p13, %p285_p12 }
  0x5e   : > { %p288_p1 = pnand %p287_p0, %p281_p9 }
  0x60   : > { %291 = shalt.err (!%p288_p1)  }
  0x61   : > { %s292_s16 = scalar_lea.vmem %s426_s19, 16  ;;  %s357_s10 = smov [#allocation4]  }
  0x62   : > { %p293_p2 = scmp.ne.s32.totalorder %s426_s19, %s292_s16  ;;  %s294_s0 = sshll.u32 %s357_s10, 4  ;;  %s295_s0 = int_to_ptr.vmem [resolvable:$false] %s294_s0 }
  0x63   : > { %s296_s1 = scalar_lea.vmem %s295_s0, 128  ;;  %p297_p3 = scmp.lt.s32.totalorder %s426_s19, %s295_s0 }
  0x64   : > { %p298_p4 = scmp.lt.s32.totalorder %s296_s1, %s292_s16 }
  0x66   : > { %p299_p5 = por %p298_p4, %p297_p3 }
  0x68   : > { %p300_p6 = pnand %p299_p5, %p293_p2 }
  0x6a   : > { %303 = shalt.err (!%p300_p6)  }
  0x6b   : > { %77 = dma.hbm_to_vmem [thread:$0]  %s64_s29, 16, %s426_s19, [#allocation5 + $0x2] }
  0x6c   : > { %s29_s2 = sadd.s32 1, %s346_s2  }
  0x6d   : > { %p26_p7 = scmp.ge.s32.totalorder %s29_s2, 8  }
  0x6e   :  { %s348_s28 = smov (%p26_p7), 0  }
  0x6f   :  { %28 = sbr.rel (!%p26_p7) target bundleno = 34 (0x22), region = 58 }
  0x76 LB: > { %336 = dma.done.wait [#allocation5], 16  ;;  %s350_s28 = sphi %s348_s28, %s83_s28  }
  0x77   : > { %337 = vsyncadd [#allocation5], 4294967280 }
  0x78   : > { %338 = dma.done.wait [#allocation5 + $0x1], 16 }
  0x79   : > { %339 = vsyncadd [#allocation5 + $0x1], 4294967280 }
  0x7a   : > { %340 = dma.done.wait [#allocation5 + $0x2], 16 }
  0x7b   : > { %341 = vsyncadd [#allocation5 + $0x2], 4294967280  ;;  %s83_s28 = sadd.s32 1, %s350_s28  }
  0x7c   : > { %p80_p8 = scmp.ge.s32.totalorder %s83_s28, 8  }
  0x7d   :  { %v92_v0 = vld [vmem:[#allocation2] sm:$0xff] (%p80_p8)  ;;  %v93_v1 = vld [vmem:[#allocation3] sm:$0xff] (%p80_p8)  ;;  %v95_v2 = vld [vmem:[#allocation4] sm:$0xff] (%p80_p8)  ;;  %v108_v7 = vlaneseq (%p80_p8)  ;;  %s358_s3 = smov (%p80_p8), [#allocation10]   ;;  %vm115_vm2 = vcmask (%p80_p8), 57344  }
  0x7e   :  { %82 = sbr.rel (!%p80_p8) target bundleno = 118 (0x76), region = 69  ;;  %v94_v3 = vadd.f32 (%p80_p8), %v93_v1, %v92_v0  ;;  %s123_s4 = sshll.u32 (%p80_p8), %s358_s3, 4  ;;  %s124_s4 = int_to_ptr.vmem [resolvable:$true] %s123_s4 }
  0x7f   :  { %v109_v8 = vand.u32 (%p80_p8), 127, %v108_v7  ;;  %v111_v9 = vshrl.u32 (%p80_p8), %v108_v7, 7  ;;  %s304_s2 = scalar_lea.vmem (%p80_p8), %s124_s4, 16  ;;  %s308_s19 = scalar_lea.vmem (%p80_p8), %s124_s4, 32 }
  0x80   :  { %v96_v4 = vsub.f32 (%p80_p8), %v94_v3, %v95_v2  ;;  %p305_p9 = scmp.ne.s32.totalorder (%p80_p8), %s124_s4, %s304_s2  ;;  %p309_p10 = scmp.lt.s32.totalorder (%p80_p8), %s124_s4, %s124_s4 }
  0x81   :  { %v112_v12 = vsub.s32 (%p80_p8), %v109_v8, %v111_v9  ;;  %p310_p11 = scmp.lt.s32.totalorder (%p80_p8), %s308_s19, %s304_s2 }
  0x82   :  { %v97_v5 = vmul.f32 (%p80_p8), %v96_v4, %v96_v4 }
  0x83   :  { %p311_p12 = por (%p80_p8), %p310_p11, %p309_p10 }
  0x84   :  { %98 = vadd.xlane.f32.xlu0 (%p80_p8), %v97_v5 }
  0x85   :  { %p312_p13 = pnand %p311_p12, %p305_p9 }
 0x111   :  { %v99_v6 = vpop.xlane.xlu0 %98 }
 0x112   :  { %196 = vrsqrt.f32 %v99_v6  ;;  %vm102_vm0 = vcmp.eq.f32.partialorder %v99_v6, inf  ;;  %v105_v13 = vand.u32 2147483648, %v99_v6  ;;  %vm104_vm1 = vcmp.eq.f32.partialorder %v99_v6, 0.0 }
 0x11c   :  { %v197_v10 = vpop.eup %196 }
 0x11d   :  { %v101_v11 = vmul.f32 %v197_v10, %v99_v6 }
 0x11f   :  { %v103_v14 = vsel %vm102_vm0, %v99_v6, %v101_v11 }
 0x120   :  { %v106_v15 = vsel %vm104_vm1, %v105_v13, %v103_v14 }
 0x121   :  { %v113_v16 = vrot.slane %v106_v15, %v112_v12 }
 0x123   :  { %116 = vst.msk [vmem:[#allocation10] sm:$0x1] %vm115_vm2, %v113_v16 }
 0x124   :  { %315 = shalt.err (!%p312_p13)
}
 0x125   :  { %s316_s14 = scalar_lea.hbm %s492_s5, 16 }
 0x126   :  { %p317_p0 = scmp.ne.s32.totalorder %s492_s5, %s316_s14  ;;  %p320_p1 = scmp.lt.u32.totalorder %s316_s14, %s492_s5 }
 0x128   :  { %p322_p2 = pnand %p320_p1, %p317_p0 }
 0x12a   :  { %325 = shalt.err (!%p322_p2)
}
 0x12b   :  { %126 = dma.vmem_to_hbm [thread:$0]  %s124_s4, 16, %s492_s5, [#allocation11]  }
 0x12c   :  { %342 = dma.done.wait [#allocation11], 16  }
 0x12d   :  { %343 = vsyncadd [#allocation11], 4294967280 }
 0x12e   :  { %130 = vsyncpa [#allocation11], 1 }
 0x12f   :  { %131 = vsyncmov [#allocation5] }
 0x132   :  { %s132_s13 = vpop.sfrf %131 }
 0x133   :  { %p173_p3 = scmp.ne.s32.totalorder %s132_s13, 0 }
 0x135   :  { %136 = shalt.err (%p173_p3)  }
 0x136   :  { %138 = vsyncmov [#allocation5 + $0x1] }
 0x139   :  { %s139_s17 = vpop.sfrf %138 }
 0x13a   :  { %p174_p4 = scmp.ne.s32.totalorder %s139_s17, 0 }
 0x13c   :  { %143 = shalt.err (%p174_p4)  }
 0x13d   :  { %145 = vsyncmov [#allocation5 + $0x2] }
 0x140   :  { %s146_s23 = vpop.sfrf %145 }
 0x141   :  { %p175_p5 = scmp.ne.s32.totalorder %s146_s23, 0 }
 0x143   :  { %150 = shalt.err (%p175_p5)  }

</bundles_post_ra>
